<compile_context>
chip_gen: v6e
topology: v6e:2x2x1
jax: 0.10.0
libtpu: 0.0.40
codegen_flags: <defaults>
</compile_context>

<pallas_src>
import jax
import jax.numpy as jnp
from jax.experimental import pallas as pl
from jax.experimental.pallas import tpu as pltpu

_INV_SQRT2 = 0.7071067811865475
_INV_SQRT2PI = 0.3989422804014327

# VMEM budget for the pipelined tiles (fits v7x's 64 MiB/TC with headroom; v5e/v6e
# have 128 MiB physical so this is conservative there).
_VMEM_BUDGET_BYTES = 40 * 1024 * 1024
_VMEM_LIMIT_BYTES = 48 * 1024 * 1024
_MIN_STEP_BYTES = 2 * 1024 * 1024   # aim for >= 2 MiB of X per grid step
_MIN_GRID_STEPS = 8                 # keep both v7x TensorCores fed


def _ei_kernel(best_f_ref, x_ref, w_ref, o_ref):
    # x_ref: (blk, d_eff) VMEM tile of (row-packed) design points
    # w_ref: (d_eff, 2k) block-diagonal [mu heads | logvar heads]
    # o_ref: (k, blk) lane-dense output tile; best_f_ref: (1,) SMEM scalar
    k = o_ref.shape[0]
    x = x_ref[...]                               # native dtype (f32/bf16) -> MXU
    w = w_ref[...].astype(x.dtype)               # tiny cast, keeps MXU in x's dtype

    # MXU: all mean / log-variance heads in one matmul -> (blk, 2k).
    proj = jnp.dot(x, w, preferred_element_type=jnp.float32)
    # XLU: small transpose so the exp/erf chain and the store are lane-dense.
    proj_t = jnp.transpose(proj, (1, 0))         # (2k, blk)
    mu = proj_t[0:k, :]                          # (k, blk)
    logvar = proj_t[k:2 * k, :]                  # (k, blk)

    sigma = jnp.exp(0.5 * logvar)                # EUP
    inv_sigma = jnp.exp(-0.5 * logvar)           # EUP reciprocal-std: no VALU divide
    z = (mu - best_f_ref[0]) * inv_sigma

    pdf = jnp.exp(-0.5 * z * z) * jnp.float32(_INV_SQRT2PI)
    cdf = 0.5 * (1.0 + jax.lax.erf(z * jnp.float32(_INV_SQRT2)))

    # Rows past the true batch (edge tile) hold unspecified data and may yield
    # inf/NaN; those lanes are either discarded by the wrapper slice or padded
    # output columns, never valid results.
    o_ref[...] = sigma * (z * cdf + pdf)         # (k, blk) unmasked lane-dense store


def _round_up(x, m):
    return ((x + m - 1) // m) * m


def _cdiv(a, b):
    return -(-a // b)


def _choose_block(num_rows, d_eff, itemsize):
    d_pad = _round_up(d_eff, 128)
    # Per-row VMEM cost (deliberately over-counted):
    #   double-buffered, lane-padded X tile
    # + (blk, 2k) f32 matmul result padded to 128 lanes (x2 slack for the transpose)
    # + transposed f32 elementwise chain (~16 temps on <= 8 sublanes)
    # + double-buffered output tile.
    per_row = 2 * d_pad * itemsize + 2 * 128 * 4 + 16 * 8 * 4 + 2 * 8 * 4
    blk_vmem = max(128, (_VMEM_BUDGET_BYTES // per_row) // 128 * 128)
    # Enough rows per step to amortize the fixed per-step pipeline overhead...
    dma_rows = _round_up(max(128, _MIN_STEP_BYTES // max(1, d_eff * itemsize)), 128)
    # ...but keep >= _MIN_GRID_STEPS steps so "parallel" can shard across 2 TCs.
    split_rows = _round_up(_cdiv(num_rows, _MIN_GRID_STEPS), 128)
    blk = min(blk_vmem, max(dma_rows, split_rows), _round_up(num_rows, 128))
    return max(128, blk)


@jax.jit
def acquisition_forward(X, w, best_f):
    """Analytic Expected-Improvement acquisition: X is (b, q=1, d) -> (b,)."""
    b, q, d = X.shape
    assert q == 1, "analytic acquisition functions require q == 1"

    # Row packing for small d: fold k = 128//d design points into one 128-lane row.
    k = 1
    if d < 128 and 128 % d == 0:
        k = 128 // d
        while k > 1 and b % k:
            k //= 2
    d_eff = k * d
    num_rows = b // k                                   # packed rows
    x2 = jnp.reshape(X, (num_rows, d_eff))              # contiguous, no-copy reshape

    if k == 1:
        w_packed = w
    else:
        # Block-diagonal weights: column j = mu head of sub-row j, column k+j = logvar.
        idx = jnp.arange(k)
        wp = jnp.zeros((k, d, 2 * k), w.dtype)
        wp = wp.at[idx, :, idx].set(w[:, 0])
        wp = wp.at[idx, :, k + idx].set(w[:, 1])
        w_packed = jnp.reshape(wp, (d_eff, 2 * k))

    bf = jnp.reshape(jnp.asarray(best_f, jnp.float32), (1,))

    blk = _choose_block(num_rows, d_eff, x2.dtype.itemsize)
    num_blocks = _cdiv(num_rows, blk)
    rows_pad = num_blocks * blk                         # pad only the tiny output

    out = pl.pallas_call(
        _ei_kernel,
        out_shape=jax.ShapeDtypeStruct((k, rows_pad), jnp.float32),
        grid=(num_blocks,),
        in_specs=[
            pl.BlockSpec(memory_space=pltpu.MemorySpace.SMEM),   # best_f scalar
            pl.BlockSpec((blk, d_eff), lambda i: (i, 0)),        # X tile, in place, no pad
            pl.BlockSpec((d_eff, 2 * k), lambda i: (0, 0)),      # weights (resident)
        ],
        out_specs=pl.BlockSpec((k, blk), lambda i: (0, i)),      # lane-dense output
        compiler_params=pltpu.CompilerParams(
            dimension_semantics=("parallel",),
            vmem_limit_bytes=_VMEM_LIMIT_BYTES,
        ),
    )(bf, x2, w_packed)

    # (k, num_rows) -> (b,): lane r of sub-row j is design point r*k + j.
    return jnp.reshape(jnp.transpose(out[:, :num_rows]), (b,))


def _reference(X, w, best_f):
    x2 = X[:, 0, :].astype(jnp.float32)
    proj = x2 @ w.astype(jnp.float32)
    mu, sigma = proj[:, 0], jnp.exp(0.5 * proj[:, 1])
    z = (mu - best_f) / sigma
    pdf = jnp.exp(-0.5 * z * z) / jnp.sqrt(2.0 * jnp.pi)
    cdf = 0.5 * (1.0 + jax.lax.erf(z / jnp.sqrt(2.0)))
    return sigma * (z * cdf + pdf)


# TODO(synk): `set_X_pending` is stateful bookkeeping with no compute; not a kernel.

if __name__ == "__main__":
    key = jax.random.PRNGKey(0)
    kx, kw = jax.random.split(key)

    b, q, d = 8, 1, 32
    X = jax.random.normal(kx, (b, q, d), dtype=jnp.float32)
    # Deterministic "fitted model" parameters: mean head + log-variance head.
    w = 0.1 * jax.random.normal(kw, (d, 2), dtype=jnp.float32)
    best_f = jnp.float32(0.25)

    ei = acquisition_forward(X, w, best_f)
    jax.block_until_ready(ei)

    ref = _reference(X, w, best_f)
    assert ei.shape == (b,)
    assert jnp.allclose(ei, ref, atol=1e-5, rtol=1e-5), (ei, ref)
    print("KERNEL_OK")
</pallas_src>

<mosaic_0001>
module attributes {stable_mosaic.version = 11 : i64} {
  func.func @_ei_kernel(%arg0: i32, %arg1: memref<1xf32, #tpu.memory_space<smem>>, %arg2: memref<128x128xf32, #tpu.memory_space<vmem>>, %arg3: memref<128x8xf32, #tpu.memory_space<vmem>>, %arg4: memref<4x128xf32, #tpu.memory_space<vmem>>) attributes {dimension_semantics = [#tpu.dimension_semantics<parallel>], iteration_bounds = array<i64: 1>, scalar_prefetch = 0 : i64, scratch_operands = 0 : i64, tpu.core_type = #tpu.core_type<tc>, window_params = [{transform_indices = @transform_0, window_bounds = array<i64: 1>}, {transform_indices = @transform_1, window_bounds = array<i64: 128, 128>}, {pipeline_mode = #tpu.pipeline_mode<synchronous>, transform_indices = @transform_2, window_bounds = array<i64: 128, 8>}, {transform_indices = @transform_3, window_bounds = array<i64: 4, 128>}]} {
    %c0 = arith.constant 0 : index
    %c0_0 = arith.constant 0 : index
    %0 = vector.load %arg2[%c0, %c0_0] : memref<128x128xf32, #tpu.memory_space<vmem>>, vector<128x128xf32>
    %c0_1 = arith.constant 0 : index
    %c0_2 = arith.constant 0 : index
    %1 = vector.load %arg3[%c0_1, %c0_2] : memref<128x8xf32, #tpu.memory_space<vmem>>, vector<128x8xf32>
    %cst = arith.constant dense<0.000000e+00> : vector<128x8xf32>
    %2 = tpu.matmul %0, %1, %cst {dimension_numbers = #tpu.dot_dimension_numbers<[1], [0], [0], [1], [0, 0, 1, 1], [], []>} : vector<128x128xf32>, vector<128x8xf32>, vector<128x8xf32> -> vector<128x8xf32>
    %3 = tpu.transpose %2, [1, 0] : vector<128x8xf32> -> vector<8x128xf32>
    %4 = vector.extract_strided_slice %3 {offsets = [0, 0], sizes = [4, 128], strides = [1, 1]} : vector<8x128xf32> to vector<4x128xf32>
    %5 = vector.extract_strided_slice %3 {offsets = [4, 0], sizes = [4, 128], strides = [1, 1]} : vector<8x128xf32> to vector<4x128xf32>
    %cst_3 = arith.constant 5.000000e-01 : f32
    %6 = vector.broadcast %cst_3 : f32 to vector<4x128xf32>
    %7 = arith.mulf %6, %5 : vector<4x128xf32>
    %8 = math.exp %7 : vector<4x128xf32>
    %cst_4 = arith.constant -5.000000e-01 : f32
    %9 = vector.broadcast %cst_4 : f32 to vector<4x128xf32>
    %10 = arith.mulf %9, %5 : vector<4x128xf32>
    %11 = math.exp %10 : vector<4x128xf32>
    %c0_5 = arith.constant 0 : index
    %12 = memref.load %arg1[%c0_5] : memref<1xf32, #tpu.memory_space<smem>>
    %13 = vector.broadcast %12 : f32 to vector<4x128xf32>
    %14 = arith.subf %4, %13 : vector<4x128xf32>
    %15 = arith.mulf %14, %11 : vector<4x128xf32>
    %cst_6 = arith.constant -5.000000e-01 : f32
    %16 = vector.broadcast %cst_6 : f32 to vector<4x128xf32>
    %17 = arith.mulf %16, %15 : vector<4x128xf32>
    %18 = arith.mulf %17, %15 : vector<4x128xf32>
    %19 = math.exp %18 : vector<4x128xf32>
    %cst_7 = arith.constant 0.398942292 : f32
    %20 = vector.broadcast %cst_7 : f32 to vector<4x128xf32>
    %21 = arith.mulf %19, %20 : vector<4x128xf32>
    %cst_8 = arith.constant 0.707106769 : f32
    %22 = vector.broadcast %cst_8 : f32 to vector<4x128xf32>
    %23 = arith.mulf %15, %22 : vector<4x128xf32>
    %24 = math.erf %23 : vector<4x128xf32>
    %cst_9 = arith.constant 1.000000e+00 : f32
    %25 = vector.broadcast %cst_9 : f32 to vector<4x128xf32>
    %26 = arith.addf %25, %24 : vector<4x128xf32>
    %cst_10 = arith.constant 5.000000e-01 : f32
    %27 = vector.broadcast %cst_10 : f32 to vector<4x128xf32>
    %28 = arith.mulf %27, %26 : vector<4x128xf32>
    %29 = arith.mulf %15, %28 : vector<4x128xf32>
    %30 = arith.addf %29, %21 : vector<4x128xf32>
    %31 = arith.mulf %8, %30 : vector<4x128xf32>
    %c0_11 = arith.constant 0 : index
    %c0_12 = arith.constant 0 : index
    %32 = vector.load %arg4[%c0_11, %c0_12] : memref<4x128xf32, #tpu.memory_space<vmem>>, vector<4x128xf32>
    tpu.vector_store %arg4[%c0_11, %c0_12], %31 {strides = array<i32>} : memref<4x128xf32, #tpu.memory_space<vmem>>, vector<4x128xf32>,
    return
  }
  func.func @transform_0(%arg0: i32) -> i32 {
    %c0_i32 = arith.constant 0 : i32
    %c0_i32_0 = arith.constant 0 : i32
    return %c0_i32 : i32
  }
  func.func @transform_1(%arg0: i32) -> (i32, i32) {
    %c0_i32 = arith.constant 0 : i32
    %c0_i32_0 = arith.constant 0 : i32
    return %arg0, %c0_i32 : i32, i32
  }
  func.func @transform_2(%arg0: i32) -> (i32, i32) {
    %c0_i32 = arith.constant 0 : i32
    %c0_i32_0 = arith.constant 0 : i32
    %c0_i32_1 = arith.constant 0 : i32
    return %c0_i32, %c0_i32_0 : i32, i32
  }
  func.func @transform_3(%arg0: i32) -> (i32, i32) {
    %c0_i32 = arith.constant 0 : i32
    %c0_i32_0 = arith.constant 0 : i32
    return %c0_i32, %arg0 : i32, i32
  }
}

</mosaic_0001>

<bundles_post_ra>
// kernel: acquisition_forward.1
= control target key start
LH: loop header
LB: loop body
LE: loop exit
PB: predicated region body
PF: predicated region fallthrough
CT: control target
= control target key end

     0   :  { %s507_s2 = inlined_call_operand.vmem [shape: f32[128,8], index: 2, kind: input, shape index: {}]   ;;  %s508_s1 = inlined_call_operand.vmem [shape: f32[2,128], index: 1, kind: input, shape index: {}]   ;;  %s509_s0 = inlined_call_operand.<no memory space> [shape: f32[1], index: 0, kind: input, shape index: {}]   ;;  %s510_s3 = inlined_call_operand.vmem [shape: f32[4,128], index: 3, kind: output, shape index: {}]  }
   0x1   :  { %v46_v0 = vld [vmem:[%s507_s2 + $0x78] sm:$0xff]  ;;  %v45_v1 = vld [vmem:[%s507_s2 + $0x70] sm:$0xff]  ;;  %v44_v2 = vld [vmem:[%s507_s2 + $0x68] sm:$0xff]  ;;  %v231_v51 = vstv %s509_s0 }
   0x2   :  { %289 = vmatprep.subr.mxu0 %v46_v0  ;;  %345 = vmatprep.subr.mxu1 %v46_v0  ;;  %v43_v3 = vld [vmem:[%s507_s2 + $0x60] sm:$0xff]  ;;  %v42_v5 = vld [vmem:[%s507_s2 + $0x58] sm:$0xff]  ;;  %v41_v6 = vld [vmem:[%s507_s2 + $0x50] sm:$0xff] }
   0x3   :  { %290 = vmatpush3.msra.mxu0 %v46_v0  ;;  %361 = vmatpush3.msra.mxu1 %v46_v0  ;;  %v15_v4 = vld [vmem:[%s508_s1] sm:$0xff]  ;;  %v40_v7 = vld [vmem:[%s507_s2 + $0x48] sm:$0xff]  ;;  %v38_v9 = vld [vmem:[%s507_s2 + $0x38] sm:$0xff] }
   0x4   :  { %291 = vmatprep.subr.mxu0 %v45_v1  ;;  %346 = vmatprep.subr.mxu1 %v45_v1  ;;  %v39_v8 = vld [vmem:[%s507_s2 + $0x40] sm:$0xff]  ;;  %v37_v10 = vld [vmem:[%s507_s2 + $0x30] sm:$0xff]  ;;  %v36_v11 = vld [vmem:[%s507_s2 + $0x28] sm:$0xff] }
   0x5   :  { %292 = vmatpush3.msra.mxu0 %v45_v1  ;;  %362 = vmatpush3.msra.mxu1 %v45_v1  ;;  %v35_v12 = vld [vmem:[%s507_s2 + $0x20] sm:$0xff]  ;;  %v34_v13 = vld [vmem:[%s507_s2 + $0x18] sm:$0xff]  ;;  %v33_v14 = vld [vmem:[%s507_s2 + $0x10] sm:$0xff] }
   0x6   :  { %293 = vmatprep.subr.mxu0 %v44_v2  ;;  %347 = vmatprep.subr.mxu1 %v44_v2  ;;  %v32_v15 = vld [vmem:[%s507_s2 + $0x8] sm:$0xff]  ;;  %v31_v16 = vld [vmem:[%s507_s2] sm:$0xff]  ;;  %v17_v18 = vld [vmem:[%s508_s1 + $0x10] sm:$0xff] }
   0x7   :  { %294 = vmatpush3.msra.mxu0 %v44_v2  ;;  %321 = vmatprep.mubr.f32.mxu0 %v15_v4  ;;  %v16_v17 = vld [vmem:[%s508_s1 + $0x8] sm:$0xff]  ;;  %v23_v19 = vld [vmem:[%s508_s1 + $0x40] sm:$0xff]  ;;  %v25_v21 = vld [vmem:[%s508_s1 + $0x50] sm:$0xff] }
   0x8   :  { %295 = vmatprep.subr.mxu0 %v43_v3  ;;  %363 = vmatpush3.msra.mxu1 %v44_v2  ;;  %v24_v20 = vld [vmem:[%s508_s1 + $0x48] sm:$0xff]  ;;  %v18_v22 = vld [vmem:[%s508_s1 + $0x18] sm:$0xff]  ;;  %v19_v23 = vld [vmem:[%s508_s1 + $0x20] sm:$0xff] }
   0x9   :  { %296 = vmatpush3.msra.mxu0 %v43_v3  ;;  %348 = vmatprep.subr.mxu1 %v43_v3  ;;  %v26_v24 = vld [vmem:[%s508_s1 + $0x58] sm:$0xff]  ;;  %v27_v25 = vld [vmem:[%s508_s1 + $0x60] sm:$0xff]  ;;  %v20_v26 = vld [vmem:[%s508_s1 + $0x28] sm:$0xff] }
   0xa   :  { %297 = vmatprep.subr.mxu0 %v42_v5  ;;  %364 = vmatpush3.msra.mxu1 %v43_v3  ;;  %v21_v27 = vld [vmem:[%s508_s1 + $0x30] sm:$0xff]  ;;  %v28_v28 = vld [vmem:[%s508_s1 + $0x68] sm:$0xff]  ;;  %v22_v30 = vld [vmem:[%s508_s1 + $0x38] sm:$0xff] }
   0xb   :  { %298 = vmatpush3.msra.mxu0 %v42_v5  ;;  %349 = vmatprep.subr.mxu1 %v42_v5  ;;  %v29_v29 = vld [vmem:[%s508_s1 + $0x70] sm:$0xff]  ;;  %v30_v31 = vld [vmem:[%s508_s1 + $0x78] sm:$0xff] }
   0xc   :  { %299 = vmatprep.subr.mxu0 %v41_v6  ;;  %365 = vmatpush3.msra.mxu1 %v42_v5 }
   0xd   :  { %300 = vmatpush3.msra.mxu0 %v41_v6  ;;  %350 = vmatprep.subr.mxu1 %v41_v6 }
   0xe   :  { %301 = vmatprep.subr.mxu0 %v40_v7  ;;  %366 = vmatpush3.msra.mxu1 %v41_v6 }
   0xf   :  { %302 = vmatpush3.msra.mxu0 %v40_v7  ;;  %351 = vmatprep.subr.mxu1 %v40_v7 }
  0x10   :  { %303 = vmatprep.subr.mxu0 %v39_v8  ;;  %367 = vmatpush3.msra.mxu1 %v40_v7 }
  0x11   :  { %304 = vmatpush3.msra.mxu0 %v39_v8  ;;  %352 = vmatprep.subr.mxu1 %v39_v8 }
  0x12   :  { %305 = vmatprep.subr.mxu0 %v38_v9  ;;  %368 = vmatpush3.msra.mxu1 %v39_v8 }
  0x13   :  { %306 = vmatpush3.msra.mxu0 %v38_v9  ;;  %353 = vmatprep.subr.mxu1 %v38_v9 }
  0x14   :  { %307 = vmatprep.subr.mxu0 %v37_v10  ;;  %369 = vmatpush3.msra.mxu1 %v38_v9 }
  0x15   :  { %308 = vmatpush3.msra.mxu0 %v37_v10  ;;  %354 = vmatprep.subr.mxu1 %v37_v10 }
  0x16   :  { %309 = vmatprep.subr.mxu0 %v36_v11  ;;  %370 = vmatpush3.msra.mxu1 %v37_v10 }
  0x17   :  { %310 = vmatpush3.msra.mxu0 %v36_v11  ;;  %355 = vmatprep.subr.mxu1 %v36_v11 }
  0x18   :  { %311 = vmatprep.subr.mxu0 %v35_v12  ;;  %371 = vmatpush3.msra.mxu1 %v36_v11 }
  0x19   :  { %312 = vmatpush3.msra.mxu0 %v35_v12  ;;  %356 = vmatprep.subr.mxu1 %v35_v12 }
  0x1a   :  { %313 = vmatprep.subr.mxu0 %v34_v13  ;;  %372 = vmatpush3.msra.mxu1 %v35_v12 }
  0x1b   :  { %314 = vmatpush3.msra.mxu0 %v34_v13  ;;  %357 = vmatprep.subr.mxu1 %v34_v13 }
  0x1c   :  { %315 = vmatprep.subr.mxu0 %v33_v14  ;;  %373 = vmatpush3.msra.mxu1 %v34_v13 }
  0x1d   :  { %316 = vmatpush3.msra.mxu0 %v33_v14  ;;  %358 = vmatprep.subr.mxu1 %v33_v14 }
  0x1e   :  { %317 = vmatprep.subr.mxu0 %v32_v15  ;;  %374 = vmatpush3.msra.mxu1 %v33_v14 }
  0x1f   :  { %318 = vmatpush3.msra.mxu0 %v32_v15  ;;  %359 = vmatprep.subr.mxu1 %v32_v15 }
  0x20   :  { %319 = vmatprep.subr.mxu0 %v31_v16  ;;  %375 = vmatpush3.msra.mxu1 %v32_v15 }
  0x21   :  { %320 = vmatpush3.msra.mxu0 %v31_v16  ;;  %360 = vmatprep.subr.mxu1 %v31_v16 }
  0x22   :  { %322 = vmatmul.mubr.f32.vlgmr.msra.gmra.mxu0 %v16_v17  ;;  %376 = vmatpush3.msra.mxu1 %v31_v16 }
  0x23   :  { %324 = vmatprep.mubr.f32.mxu0 %v17_v18  ;;  %333 = vmatprep.mubr.f32.mxu1 %v23_v19 }
  0x24   :  { %334 = vmatmul.mubr.f32.vlgmr.msra.gmra.mxu1 %v24_v20 }
  0x25   :  { %336 = vmatprep.mubr.f32.mxu1 %v25_v21 }
  0x26   :  { %325 = vmatmul.mubr.f32.gmra.mxu0 %v18_v22 }
  0x27   :  { %327 = vmatprep.mubr.f32.mxu0 %v19_v23 }
  0x28   :  { %337 = vmatmul.mubr.f32.gmra.mxu1 %v26_v24 }
  0x29   :  { %339 = vmatprep.mubr.f32.mxu1 %v27_v25 }
  0x2a   :  { %328 = vmatmul.mubr.f32.gmra.mxu0 %v20_v26 }
  0x2b   :  { %330 = vmatprep.mubr.f32.mxu0 %v21_v27 }
  0x2c   :  { %340 = vmatmul.mubr.f32.gmra.mxu1 %v28_v28 }
  0x2d   :  { %342 = vmatprep.mubr.f32.mxu1 %v29_v29 }
  0x2e   :  { %331 = vmatmul.mubr.f32.gmra.mxu0 %v22_v30 }
  0x30   :  { %343 = vmatmul.mubr.f32.gmra.mxu1 %v30_v31 }
  0xe2   :  { %v323_v32 = vpop.f32.mrf.mxu0 }
  0xe4   :  { %v113_v33 = vpop.f32.mrf.mxu0  ;;  %v335_v40 = vpop.f32.mrf.mxu1 }
  0xe5   :  { %192 = vxpose.xlu0.b32.start [1/16] (narrow) %v113_v33, 8 }
  0xe6   :  { %v326_v34 = vpop.f32.mrf.mxu0  ;;  %v153_v41 = vpop.f32.mrf.mxu1 }
  0xe8   :  { %v123_v35 = vpop.f32.mrf.mxu0  ;;  %v338_v42 = vpop.f32.mrf.mxu1 }
  0xe9   :  { %193 = vxpose.xlu0.b32.cont [2/16] (narrow) %v323_v32, 8 }
  0xea   :  { %v329_v36 = vpop.f32.mrf.mxu0  ;;  %v163_v43 = vpop.f32.mrf.mxu1 }
  0xec   :  { %v133_v37 = vpop.f32.mrf.mxu0  ;;  %v341_v44 = vpop.f32.mrf.mxu1 }
  0xed   :  { %194 = vxpose.xlu0.b32.cont [3/16] (narrow) %v123_v35, 8 }
  0xee   :  { %v332_v38 = vpop.f32.mrf.mxu0  ;;  %v173_v45 = vpop.f32.mrf.mxu1 }
  0xf0   :  { %v143_v39 = vpop.f32.mrf.mxu0  ;;  %v344_v46 = vpop.f32.mrf.mxu1 }
  0xf1   :  { %195 = vxpose.xlu0.b32.cont [4/16] (narrow) %v326_v34, 8 }
  0xf2   :  { %v183_v47 = vpop.f32.mrf.mxu1 }
  0xf5   :  { %196 = vxpose.xlu0.b32.cont [5/16] (narrow) %v133_v37, 8 }
  0xf9   :  { %197 = vxpose.xlu0.b32.cont [6/16] (narrow) %v329_v36, 8 }
  0xfd   :  { %198 = vxpose.xlu0.b32.cont [7/16] (narrow) %v143_v39, 8 }
 0x101   :  { %199 = vxpose.xlu0.b32.cont [8/16] (narrow) %v332_v38, 8 }
 0x105   :  { %200 = vxpose.xlu0.b32.cont [9/16] (narrow) %v153_v41, 8 }
 0x109   :  { %201 = vxpose.xlu0.b32.cont [10/16] (narrow) %v335_v40, 8 }
 0x10d   :  { %202 = vxpose.xlu0.b32.cont [11/16] (narrow) %v163_v43, 8 }
 0x111   :  { %203 = vxpose.xlu0.b32.cont [12/16] (narrow) %v338_v42, 8 }
 0x115   :  { %204 = vxpose.xlu0.b32.cont [13/16] (narrow) %v173_v45, 8 }
 0x119   :  { %205 = vxpose.xlu0.b32.cont [14/16] (narrow) %v341_v44, 8 }
 0x11d   :  { %206 = vxpose.xlu0.b32.cont [15/16] (narrow) %v183_v47, 8 }
 0x121   :  { %207 = vxpose.xlu0.b32.end [16/16] (narrow) %v344_v46, 8 }
 0x161   :  { %v208_v48 = vpop.trf.xlu0 }
 0x162   :  { %v227_v49 = vmul.f32 -0.5, %v208_v48  ;;  %v232_v53 = vsub.f32 %v208_v48, %v231_v51  ;;  %v224_v59 = vmul.f32 0.5, %v208_v48 }
 0x164   :  { %v228_v50 = vmul.f32 1.442695, %v227_v49  ;;  %v225_v61 = vmul.f32 1.442695, %v224_v59 }
 0x166   :  { %377 = vpow2.f32 %v228_v50 }
 0x173   :  { %v378_v52 = vpop.eup %377 }
 0x174   :  { %v234_v54 = vrot.slane %v378_v52, 4 }
 0x176   :  { %v236_v55 = vmul.f32 %v234_v54, %v232_v53 }
 0x178   :  { %v237_v56 = vmul.f32 -0.5, %v236_v55  ;;  %v242_v57 = vmul.f32 0.70710677, %v236_v55 }
 0x17a   :  { %v238_v58 = vmul.f32 %v237_v56, %v236_v55  ;;  %379 = verf.f32 %v242_v57 }
 0x17c   :  { %v239_v60 = vmul.f32 1.442695, %v238_v58 }
 0x17e   :  { %381 = vpow2.f32 %v239_v60 }
 0x17f   :  { %383 = vpow2.f32 %v225_v61 }
 0x187   :  { %v380_v62 = vpop.eup %379 }
 0x188   :  { %v244_v63 = vadd.f32 1.0, %v380_v62 }
 0x18a   :  { %v245_v0 = vmul.f32 0.5, %v244_v63 }
 0x18b   :  { %v382_v1 = vpop.eup %381 }
 0x18c   :  { %v241_v2 = vmul.f32 0.3989423, %v382_v1  ;;  %v246_v3 = vmul.f32 %v245_v0, %v236_v55  ;;  %v384_v6 = vpop.eup %383 }
 0x18e   :  { %v247_v4 = vadd.f32 %v246_v3, %v241_v2 }
 0x190   :  { %v249_v5 = vrot.slane %v247_v4, 4 }
 0x192   :  { %v251_v7 = vmul.f32 %v384_v6, %v249_v5 }
 0x194   :  { %252 = vst [vmem:[%s510_s3 - $0x4] sm:$0xf0] %v251_v7 }

</bundles_post_ra>
